<compile_context>
chip_gen: v6e
topology: v6e:2x2x1
jax: 0.10.0
libtpu: 0.0.40
codegen_flags: <defaults>
</compile_context>

<pallas_src>
import jax
import jax.numpy as jnp
from jax.experimental import pallas as pl
from jax.experimental.pallas import tpu as pltpu


def _round_up(n, m):
    return ((n + m - 1) // m) * m


def _decoder_kernel(x_ref,
                    w1_ref, b1_ref,
                    w2_ref, b2_ref,
                    w3_ref, b3_ref,
                    w4_ref, b4_ref,
                    o_ref):
    """Fused MLP decoder: 3x (Linear+ReLU) + final Linear + Sigmoid."""
    h = x_ref[...]
    # Layer 1: latent_dim -> dec_dim[0], ReLU  (K=15 is one short MXU push)
    h = jnp.dot(h, w1_ref[...], preferred_element_type=jnp.float32) + b1_ref[...]
    h = jnp.maximum(h, 0.0)
    # Layer 2: dec_dim[0] -> dec_dim[1], ReLU
    h = jnp.dot(h, w2_ref[...], preferred_element_type=jnp.float32) + b2_ref[...]
    h = jnp.maximum(h, 0.0)
    # Layer 3: dec_dim[1] -> dec_dim[2], ReLU
    h = jnp.dot(h, w3_ref[...], preferred_element_type=jnp.float32) + b3_ref[...]
    h = jnp.maximum(h, 0.0)
    # Final dense: dec_dim[2] -> padded in_channels, then Sigmoid (use_act=True)
    h = jnp.dot(h, w4_ref[...], preferred_element_type=jnp.float32) + b4_ref[...]
    o_ref[...] = jax.nn.sigmoid(h)


def expression_matrix_decoder(x, params, *, block_m=512):
    """x: [B, latent_dim] float32. params: dict of weights/biases.

    Weights: w_i of shape [in, out] (transposed vs. nn.Linear's [out, in]),
    biases b_i of shape [1, out]. Returns [B, in_channels] float32.
    """
    B, latent_dim = x.shape
    w1, b1 = params["w1"], params["b1"]
    w2, b2 = params["w2"], params["b2"]
    w3, b3 = params["w3"], params["b3"]
    w4, b4 = params["w4"], params["b4"]
    in_channels = w4.shape[1]

    # --- lane-dense output: pad N up to a multiple of 128 --------------------
    n_out = _round_up(in_channels, 128)
    if n_out != in_channels:
        w4p = jnp.pad(w4, ((0, 0), (0, n_out - in_channels)))
        b4p = jnp.pad(b4, ((0, 0), (0, n_out - in_channels)))
    else:
        w4p, b4p = w4, b4

    # --- batch tiling: big M tiles, pad instead of asserting -----------------
    # If the whole batch fits in one tile, run one grid step; otherwise use
    # block_m-row tiles (block_m is a multiple of 256 -> good on v5e/v6e/v7x).
    bm = min(block_m, _round_up(B, 8))
    bm = _round_up(bm, 8)
    B_pad = _round_up(B, bm)
    xp = jnp.pad(x, ((0, B_pad - B), (0, 0))) if B_pad != B else x
    grid = (B_pad // bm,)

    def resident(shape):
        # Whole-array block, invariant across the batch grid axis.
        return pl.BlockSpec(shape, lambda i: (0, 0))

    out = pl.pallas_call(
        _decoder_kernel,
        out_shape=jax.ShapeDtypeStruct((B_pad, n_out), jnp.float32),
        grid_spec=pltpu.PrefetchScalarGridSpec(
            num_scalar_prefetch=0,
            grid=grid,
            in_specs=[
                pl.BlockSpec((bm, latent_dim), lambda i: (i, 0)),  # x tile
                resident(w1.shape), resident(b1.shape),
                resident(w2.shape), resident(b2.shape),
                resident(w3.shape), resident(b3.shape),
                resident(w4p.shape), resident(b4p.shape),
            ],
            out_specs=pl.BlockSpec((bm, n_out), lambda i: (i, 0)),
        ),
        compiler_params=pltpu.CompilerParams(
            dimension_semantics=("parallel",),
        ),
    )(xp, w1, b1, w2, b2, w3, b3, w4p, b4p)

    return out[:B, :in_channels]


def init_params(key, in_channels, latent_dim, dec_dim):
    """Deterministic synthetic init (shapes match the PyTorch module)."""
    dims = [latent_dim] + list(dec_dim) + [in_channels]
    params = {}
    keys = jax.random.split(key, len(dims) - 1)
    for idx, (d_in, d_out) in enumerate(zip(dims[:-1], dims[1:]), start=1):
        kw, kb = jax.random.split(keys[idx - 1])
        scale = 1.0 / jnp.sqrt(jnp.float32(d_in))
        params[f"w{idx}"] = jax.random.uniform(
            kw, (d_in, d_out), jnp.float32, -scale, scale)
        params[f"b{idx}"] = jax.random.uniform(
            kb, (1, d_out), jnp.float32, -scale, scale)
    return params


def reference_forward(x, params):
    """Pure-JAX reference identical to the PyTorch forward semantics."""
    h = x
    for idx in (1, 2, 3):
        h = jnp.maximum(h @ params[f"w{idx}"] + params[f"b{idx}"], 0.0)
    h = h @ params["w4"] + params["b4"]
    return jax.nn.sigmoid(h)


if __name__ == "__main__":
    key = jax.random.PRNGKey(0)
    k_x, k_p = jax.random.split(key)

    in_channels = 64          # decoded expression-matrix feature count
    latent_dim = 15
    dec_dim = [128, 256, 512]
    batch = 16

    params = init_params(k_p, in_channels, latent_dim, dec_dim)
    x = jax.random.normal(k_x, (batch, latent_dim), jnp.float32)

    out = expression_matrix_decoder(x, params)
    out = jax.block_until_ready(out)

    ref = reference_forward(x, params)
    assert out.shape == (batch, in_channels)
    assert jnp.allclose(out, ref, atol=1e-5, rtol=1e-5), (
        f"max err {jnp.max(jnp.abs(out - ref))}")

    print("KERNEL_OK")
</pallas_src>

<mosaic_0001>
module attributes {stable_mosaic.version = 11 : i64} {
  func.func @_decoder_kernel(%arg0: i32, %arg1: memref<16x15xf32, #tpu.memory_space<vmem>>, %arg2: memref<15x128xf32, #tpu.memory_space<vmem>>, %arg3: memref<1x128xf32, #tpu.memory_space<vmem>>, %arg4: memref<128x256xf32, #tpu.memory_space<vmem>>, %arg5: memref<1x256xf32, #tpu.memory_space<vmem>>, %arg6: memref<256x512xf32, #tpu.memory_space<vmem>>, %arg7: memref<1x512xf32, #tpu.memory_space<vmem>>, %arg8: memref<512x128xf32, #tpu.memory_space<vmem>>, %arg9: memref<1x128xf32, #tpu.memory_space<vmem>>, %arg10: memref<16x128xf32, #tpu.memory_space<vmem>>) attributes {dimension_semantics = [#tpu.dimension_semantics<parallel>], iteration_bounds = array<i64: 1>, scalar_prefetch = 0 : i64, scratch_operands = 0 : i64, tpu.core_type = #tpu.core_type<tc>, window_params = [{transform_indices = @transform_0, window_bounds = array<i64: 16, 15>}, {pipeline_mode = #tpu.pipeline_mode<synchronous>, transform_indices = @transform_1, window_bounds = array<i64: 15, 128>}, {pipeline_mode = #tpu.pipeline_mode<synchronous>, transform_indices = @transform_2, window_bounds = array<i64: 1, 128>}, {pipeline_mode = #tpu.pipeline_mode<synchronous>, transform_indices = @transform_3, window_bounds = array<i64: 128, 256>}, {pipeline_mode = #tpu.pipeline_mode<synchronous>, transform_indices = @transform_4, window_bounds = array<i64: 1, 256>}, {pipeline_mode = #tpu.pipeline_mode<synchronous>, transform_indices = @transform_5, window_bounds = array<i64: 256, 512>}, {pipeline_mode = #tpu.pipeline_mode<synchronous>, transform_indices = @transform_6, window_bounds = array<i64: 1, 512>}, {pipeline_mode = #tpu.pipeline_mode<synchronous>, transform_indices = @transform_7, window_bounds = array<i64: 512, 128>}, {pipeline_mode = #tpu.pipeline_mode<synchronous>, transform_indices = @transform_8, window_bounds = array<i64: 1, 128>}, {transform_indices = @transform_9, window_bounds = array<i64: 16, 128>}]} {
    %c0 = arith.constant 0 : index
    %c0_0 = arith.constant 0 : index
    %0 = vector.load %arg1[%c0, %c0_0] : memref<16x15xf32, #tpu.memory_space<vmem>>, vector<16x15xf32>
    %c0_1 = arith.constant 0 : index
    %c0_2 = arith.constant 0 : index
    %1 = vector.load %arg2[%c0_1, %c0_2] : memref<15x128xf32, #tpu.memory_space<vmem>>, vector<15x128xf32>
    %cst = arith.constant dense<0.000000e+00> : vector<16x128xf32>
    %2 = tpu.matmul %0, %1, %cst {dimension_numbers = #tpu.dot_dimension_numbers<[1], [0], [0], [1], [0, 0, 1, 1], [], []>} : vector<16x15xf32>, vector<15x128xf32>, vector<16x128xf32> -> vector<16x128xf32>
    %c0_3 = arith.constant 0 : index
    %c0_4 = arith.constant 0 : index
    %3 = vector.load %arg3[%c0_3, %c0_4] : memref<1x128xf32, #tpu.memory_space<vmem>>, vector<1x128xf32>
    %4 = vector.broadcast %3 : vector<1x128xf32> to vector<16x128xf32>
    %5 = arith.addf %2, %4 : vector<16x128xf32>
    %cst_5 = arith.constant 0.000000e+00 : f32
    %6 = vector.broadcast %cst_5 : f32 to vector<16x128xf32>
    %7 = arith.maximumf %5, %6 : vector<16x128xf32>
    %c0_6 = arith.constant 0 : index
    %c0_7 = arith.constant 0 : index
    %8 = vector.load %arg4[%c0_6, %c0_7] : memref<128x256xf32, #tpu.memory_space<vmem>>, vector<128x256xf32>
    %cst_8 = arith.constant dense<0.000000e+00> : vector<16x256xf32>
    %9 = tpu.matmul %7, %8, %cst_8 {dimension_numbers = #tpu.dot_dimension_numbers<[1], [0], [0], [1], [0, 0, 1, 1], [], []>} : vector<16x128xf32>, vector<128x256xf32>, vector<16x256xf32> -> vector<16x256xf32>
    %c0_9 = arith.constant 0 : index
    %c0_10 = arith.constant 0 : index
    %10 = vector.load %arg5[%c0_9, %c0_10] : memref<1x256xf32, #tpu.memory_space<vmem>>, vector<1x256xf32>
    %11 = vector.broadcast %10 : vector<1x256xf32> to vector<16x256xf32>
    %12 = arith.addf %9, %11 : vector<16x256xf32>
    %cst_11 = arith.constant 0.000000e+00 : f32
    %13 = vector.broadcast %cst_11 : f32 to vector<16x256xf32>
    %14 = arith.maximumf %12, %13 : vector<16x256xf32>
    %c0_12 = arith.constant 0 : index
    %c0_13 = arith.constant 0 : index
    %15 = vector.load %arg6[%c0_12, %c0_13] : memref<256x512xf32, #tpu.memory_space<vmem>>, vector<256x512xf32>
    %cst_14 = arith.constant dense<0.000000e+00> : vector<16x512xf32>
    %16 = tpu.matmul %14, %15, %cst_14 {dimension_numbers = #tpu.dot_dimension_numbers<[1], [0], [0], [1], [0, 0, 1, 1], [], []>} : vector<16x256xf32>, vector<256x512xf32>, vector<16x512xf32> -> vector<16x512xf32>
    %c0_15 = arith.constant 0 : index
    %c0_16 = arith.constant 0 : index
    %17 = vector.load %arg7[%c0_15, %c0_16] : memref<1x512xf32, #tpu.memory_space<vmem>>, vector<1x512xf32>
    %18 = vector.broadcast %17 : vector<1x512xf32> to vector<16x512xf32>
    %19 = arith.addf %16, %18 : vector<16x512xf32>
    %cst_17 = arith.constant 0.000000e+00 : f32
    %20 = vector.broadcast %cst_17 : f32 to vector<16x512xf32>
    %21 = arith.maximumf %19, %20 : vector<16x512xf32>
    %c0_18 = arith.constant 0 : index
    %c0_19 = arith.constant 0 : index
    %22 = vector.load %arg8[%c0_18, %c0_19] : memref<512x128xf32, #tpu.memory_space<vmem>>, vector<512x128xf32>
    %cst_20 = arith.constant dense<0.000000e+00> : vector<16x128xf32>
    %23 = tpu.matmul %21, %22, %cst_20 {dimension_numbers = #tpu.dot_dimension_numbers<[1], [0], [0], [1], [0, 0, 1, 1], [], []>} : vector<16x512xf32>, vector<512x128xf32>, vector<16x128xf32> -> vector<16x128xf32>
    %c0_21 = arith.constant 0 : index
    %c0_22 = arith.constant 0 : index
    %24 = vector.load %arg9[%c0_21, %c0_22] : memref<1x128xf32, #tpu.memory_space<vmem>>, vector<1x128xf32>
    %25 = vector.broadcast %24 : vector<1x128xf32> to vector<16x128xf32>
    %26 = arith.addf %23, %25 : vector<16x128xf32>
    %27 = arith.negf %26 : vector<16x128xf32>
    %28 = math.exp %27 : vector<16x128xf32>
    %cst_23 = arith.constant 1.000000e+00 : f32
    %29 = vector.broadcast %cst_23 : f32 to vector<16x128xf32>
    %30 = arith.addf %29, %28 : vector<16x128xf32>
    %31 = arith.divf %29, %30 : vector<16x128xf32>
    %c0_24 = arith.constant 0 : index
    %c0_25 = arith.constant 0 : index
    %32 = vector.load %arg10[%c0_24, %c0_25] : memref<16x128xf32, #tpu.memory_space<vmem>>, vector<16x128xf32>
    tpu.vector_store %arg10[%c0_24, %c0_25], %31 {strides = array<i32>} : memref<16x128xf32, #tpu.memory_space<vmem>>, vector<16x128xf32>,
    return
  }
  func.func @transform_0(%arg0: i32) -> (i32, i32) {
    %c0_i32 = arith.constant 0 : i32
    %c0_i32_0 = arith.constant 0 : i32
    return %arg0, %c0_i32 : i32, i32
  }
  func.func @transform_1(%arg0: i32) -> (i32, i32) {
    %c0_i32 = arith.constant 0 : i32
    %c0_i32_0 = arith.constant 0 : i32
    %c0_i32_1 = arith.constant 0 : i32
    return %c0_i32, %c0_i32_0 : i32, i32
  }
  func.func @transform_2(%arg0: i32) -> (i32, i32) {
    %c0_i32 = arith.constant 0 : i32
    %c0_i32_0 = arith.constant 0 : i32
    %c0_i32_1 = arith.constant 0 : i32
    return %c0_i32, %c0_i32_0 : i32, i32
  }
  func.func @transform_3(%arg0: i32) -> (i32, i32) {
    %c0_i32 = arith.constant 0 : i32
    %c0_i32_0 = arith.constant 0 : i32
    %c0_i32_1 = arith.constant 0 : i32
    return %c0_i32, %c0_i32_0 : i32, i32
  }
  func.func @transform_4(%arg0: i32) -> (i32, i32) {
    %c0_i32 = arith.constant 0 : i32
    %c0_i32_0 = arith.constant 0 : i32
    %c0_i32_1 = arith.constant 0 : i32
    return %c0_i32, %c0_i32_0 : i32, i32
  }
  func.func @transform_5(%arg0: i32) -> (i32, i32) {
    %c0_i32 = arith.constant 0 : i32
    %c0_i32_0 = arith.constant 0 : i32
    %c0_i32_1 = arith.constant 0 : i32
    return %c0_i32, %c0_i32_0 : i32, i32
  }
  func.func @transform_6(%arg0: i32) -> (i32, i32) {
    %c0_i32 = arith.constant 0 : i32
    %c0_i32_0 = arith.constant 0 : i32
    %c0_i32_1 = arith.constant 0 : i32
    return %c0_i32, %c0_i32_0 : i32, i32
  }
  func.func @transform_7(%arg0: i32) -> (i32, i32) {
    %c0_i32 = arith.constant 0 : i32
    %c0_i32_0 = arith.constant 0 : i32
    %c0_i32_1 = arith.constant 0 : i32
    return %c0_i32, %c0_i32_0 : i32, i32
  }
  func.func @transform_8(%arg0: i32) -> (i32, i32) {
    %c0_i32 = arith.constant 0 : i32
    %c0_i32_0 = arith.constant 0 : i32
    %c0_i32_1 = arith.constant 0 : i32
    return %c0_i32, %c0_i32_0 : i32, i32
  }
  func.func @transform_9(%arg0: i32) -> (i32, i32) {
    %c0_i32 = arith.constant 0 : i32
    %c0_i32_0 = arith.constant 0 : i32
    return %arg0, %c0_i32 : i32, i32
  }
}

</mosaic_0001>

<bundles_post_ra>
// kernel: tpu_custom_call.1
= control target key start
LH: loop header
LB: loop body
LE: loop exit
PB: predicated region body
PF: predicated region fallthrough
CT: control target
= control target key end

     0   :  { %14 = vsyncpa [#allocation3], 0  ;;  %s1257_s0 = inlined_call_operand.hbm [shape: f32[16,15], index: 0, kind: input, shape index: {}]   ;;  %s1258_s1 = inlined_call_operand.hbm [shape: f32[15,128], index: 1, kind: input, shape index: {}]   ;;  %s1259_s2 = inlined_call_operand.vmem [shape: f32[1,128], index: 2, kind: input, shape index: {}]   ;;  %s1260_s3 = inlined_call_operand.hbm [shape: f32[128,256], index: 3, kind: input, shape index: {}]   ;;  %s1261_s4 = inlined_call_operand.vmem [shape: f32[1,256], index: 4, kind: input, shape index: {}]   ;;  %s1262_s5 = inlined_call_operand.hbm [shape: f32[256,512], index: 5, kind: input, shape index: {}]   ;;  %s1263_s6 = inlined_call_operand.vmem [shape: f32[1,512], index: 6, kind: input, shape index: {}]   ;;  %s1264_s7 = inlined_call_operand.hbm [shape: f32[512,128], index: 7, kind: input, shape index: {}]   ;;  %s1265_s8 = inlined_call_operand.vmem [shape: f32[1,128], index: 8, kind: input, shape index: {}]   ;;  %s1266_s9 = inlined_call_operand.hbm [shape: f32[16,128], index: 9, kind: output, shape index: {}]  }
   0x1   :  { %15 = vsyncpa [#allocation6], 0 }
   0x2   :  { %16 = vsyncpa [#allocation9], 0 }
   0x3   :  { %17 = vsyncpa [#allocation4], 0  ;;  %s1134_s30 = smov [#allocation5]   ;;  %s1135_s11 = smov [#allocation8]  }
   0x4   :  { %s35_s10 = sshll.u32 %s1134_s30, 4  ;;  %s63_s12 = sshll.u32 %s1135_s11, 4  ;;  %s36_s10 = int_to_ptr.vmem [resolvable:$true] %s35_s10  ;;  %s64_s12 = int_to_ptr.vmem [resolvable:$true] %s63_s12 }
   0x5   :  { %s1014_s13 = scalar_lea.vmem %s36_s10, 256  ;;  %p1019_p1 = scmp.lt.s32.totalorder %s36_s10, %s36_s10 }
   0x6   :  { %p1015_p0 = scmp.ne.s32.totalorder %s36_s10, %s1014_s13  ;;  %p1020_p2 = scmp.lt.s32.totalorder %s1014_s13, %s1014_s13 }
   0x8   :  { %p1021_p3 = por %p1020_p2, %p1019_p1 }
   0xa   :  { %p1022_p4 = pnand %p1021_p3, %p1015_p0 }
   0xc   :  { %1025 = shalt.err (!%p1022_p4)
}
   0xd   :  { %s1136_s14 = smov 128   ;;  %s1137_s15 = smov 8  }
   0xe   :  { %41 = dma.hbm_to_vmem [thread:$0]  %s1258_s1, 256, %s36_s10, [#allocation6], %s1136_s14, %s1136_s14, %s1137_s15  }
   0xf   :  { %s1034_s18 = scalar_lea.vmem %s64_s12, 16384  ;;  %p1039_p6 = scmp.lt.s32.totalorder %s64_s12, %s64_s12 }
  0x10   :  { %p1035_p5 = scmp.ne.s32.totalorder %s64_s12, %s1034_s18  ;;  %p1040_p7 = scmp.lt.s32.totalorder %s1034_s18, %s1034_s18 }
  0x12   :  { %p1041_p8 = por %p1040_p7, %p1039_p6 }
  0x14   :  { %p1042_p9 = pnand %p1041_p8, %p1035_p5 }
  0x16   :  { %1045 = shalt.err (!%p1042_p9)
}
  0x17   :  { %s1138_s19 = smov 512   ;;  %s1139_s20 = smov 32  }
  0x18   :  { %69 = dma.hbm_to_vmem [thread:$0]  %s1262_s5, 16384, %s64_s12, [#allocation9], %s1138_s19, %s1138_s19, %s1139_s20  }
  0x19   :  { %s1140_s23 = smov [#allocation2]   ;;  %s1141_s25 = smov [#allocation7]  }
  0x1a   :  { %s23_s24 = sshll.u32 %s1140_s23, 4  ;;  %s49_s26 = sshll.u32 %s1141_s25, 4  ;;  %s24_s24 = int_to_ptr.vmem [resolvable:$true] %s23_s24  ;;  %s50_s26 = int_to_ptr.vmem [resolvable:$true] %s49_s26 }
  0x1b   :  { %s1054_s1 = scalar_lea.vmem %s24_s24, 256  ;;  %p1059_p11 = scmp.lt.s32.totalorder %s24_s24, %s24_s24 }
  0x1c   :  { %p1055_p10 = scmp.ne.s32.totalorder %s24_s24, %s1054_s1  ;;  %p1060_p12 = scmp.lt.s32.totalorder %s1054_s1, %s1054_s1 }
  0x1e   :  { %p1061_p13 = por %p1060_p12, %p1059_p11 }
  0x20   :  { %p1062_p0 = pnand %p1061_p13, %p1055_p10 }
  0x22   :  { %1065 = shalt.err (!%p1062_p0)
}
  0x23   :  { %29 = dma.hbm_to_vmem [thread:$0]  %s1257_s0, 256, %s24_s24, [#allocation3], %s1136_s14, %s1136_s14, %s1137_s15  }
  0x24   :  { %s1074_s5 = scalar_lea.vmem %s50_s26, 4096  ;;  %p1079_p2 = scmp.lt.s32.totalorder %s50_s26, %s50_s26 }
  0x25   :  { %p1075_p1 = scmp.ne.s32.totalorder %s50_s26, %s1074_s5  ;;  %p1080_p3 = scmp.lt.s32.totalorder %s1074_s5, %s1074_s5 }
  0x27   :  { %p1081_p4 = por %p1080_p3, %p1079_p2 }
  0x29   :  { %p1082_p5 = pnand %p1081_p4, %p1075_p1 }
  0x2b   :  { %1085 = shalt.err (!%p1082_p5)
}
  0x2c   :  { %s1142_s29 = smov 256   ;;  %s1143_s30 = smov 16  }
  0x2d   :  { %55 = dma.hbm_to_vmem [thread:$0]  %s1260_s3, 4096, %s50_s26, [#allocation6], %s1142_s29, %s1142_s29, %s1143_s30  }
  0x2e   :  { %s1144_s12 = smov [#allocation10]  }
  0x2f   :  { %s77_s13 = sshll.u32 %s1144_s12, 4  ;;  %s78_s13 = int_to_ptr.vmem [resolvable:$true] %s77_s13 }
  0x30   :  { %s1094_s16 = scalar_lea.vmem %s78_s13, 8192  ;;  %p1099_p7 = scmp.lt.s32.totalorder %s78_s13, %s78_s13 }
  0x31   :  { %p1095_p6 = scmp.ne.s32.totalorder %s78_s13, %s1094_s16  ;;  %p1100_p8 = scmp.lt.s32.totalorder %s1094_s16, %s1094_s16 }
  0x33   :  { %p1101_p9 = por %p1100_p8, %p1099_p7 }
  0x35   :  { %p1102_p10 = pnand %p1101_p9, %p1095_p6 }
  0x37   :  { %1105 = shalt.err (!%p1102_p10)
}
  0x38   :  { %83 = dma.hbm_to_vmem [thread:$0]  %s1264_s7, 8192, %s78_s13, [#allocation9], %s1136_s14, %s1136_s14, %s1137_s15  }
  0x39   :  { %1126 = dma.done.wait [#allocation3], 256  }
  0x3a   :  { %1127 = vsyncadd [#allocation3], 4294967040 }
  0x3b   :  { %1128 = dma.done.wait [#allocation6], 4352  }
  0x3c   :  { %1129 = vsyncadd [#allocation6], 4294962944 }
  0x3d   :  { %1130 = dma.done.wait [#allocation9], 24576  }
  0x3e   :  { %1131 = vsyncadd [#allocation9], 4294942720  ;;  %vm119_vm0 = vcmask 1046528   ;;  %vm112_vm1 = vcmask 121856   ;;  %v104_v0 = vld [vmem:[#allocation5 + $0x8] sm:$0x7f] }
  0x3f   :  { %v103_v1 = vld [vmem:[#allocation5] sm:$0xff]  ;;  %v101_v2 = vld [vmem:[#allocation2] sm:$0xff]  ;;  %978 = vmatprep.subr.msk.mxu0 %vm119_vm0, %v104_v0  ;;  %v231_v3 = vld [vmem:[#allocation7 + $0xf8] sm:$0xff]  ;;  %v1145_v36 = vmov 0.0  }
  0x40   :  { %982 = vmatprep.mubr.msk.f32.mxu0 %vm112_vm1, %v101_v2  ;;  %v230_v4 = vld [vmem:[#allocation7 + $0xf0] sm:$0xff]  ;;  %979 = vmatpush3.msk.msra.mxu0 %vm119_vm0, %v104_v0  ;;  %v102_v5 = vld [vmem:[#allocation2 + $0x8] sm:$0xff]  ;;  %v228_v7 = vld [vmem:[#allocation7 + $0xe0] sm:$0xff] }
  0x41   :  { %244 = vmatprep.subr.mxu1 %v231_v3  ;;  %v229_v6 = vld [vmem:[#allocation7 + $0xe8] sm:$0xff]  ;;  %980 = vmatprep.subr.mxu0 %v103_v1  ;;  %v227_v8 = vld [vmem:[#allocation7 + $0xd8] sm:$0xff]  ;;  %v226_v9 = vld [vmem:[#allocation7 + $0xd0] sm:$0xff] }
  0x42   :  { %245 = vmatpush1.msra.mxu1 %v230_v4  ;;  %981 = vmatpush3.msra.mxu0 %v103_v1  ;;  %v225_v10 = vld [vmem:[#allocation7 + $0xc8] sm:$0xff]  ;;  %v224_v11 = vld [vmem:[#allocation7 + $0xc0] sm:$0xff]  ;;  %v223_v12 = vld [vmem:[#allocation7 + $0xb8] sm:$0xff] }
  0x43   :  { %246 = vmatprep.subr.mxu1 %v229_v6  ;;  %983 = vmatmul.mubr.msk.f32.vlgmr.msra.gmra.mxu0 %vm112_vm1, %v102_v5  ;;  %v222_v13 = vld [vmem:[#allocation7 + $0xb0] sm:$0xff]  ;;  %v221_v14 = vld [vmem:[#allocation7 + $0xa8] sm:$0xff]  ;;  %v220_v15 = vld [vmem:[#allocation7 + $0xa0] sm:$0xff] }
  0x44   :  { %247 = vmatpush1.msra.mxu1 %v228_v7  ;;  %v219_v16 = vld [vmem:[#allocation7 + $0x98] sm:$0xff]  ;;  %v218_v17 = vld [vmem:[#allocation7 + $0x90] sm:$0xff]  ;;  %v217_v18 = vld [vmem:[#allocation7 + $0x88] sm:$0xff]  ;;  %308 = vmatprep.mubr.f32.mxu1 %v1145_v36 }
  0x45   :  { %248 = vmatprep.subr.mxu1 %v227_v8  ;;  %v216_v19 = vld [vmem:[#allocation7 + $0x80] sm:$0xff]  ;;  %v215_v20 = vld [vmem:[#allocation7 + $0x78] sm:$0xff]  ;;  %v214_v21 = vld [vmem:[#allocation7 + $0x70] sm:$0xff] }
  0x46   :  { %249 = vmatpush1.msra.mxu1 %v226_v9  ;;  %v213_v22 = vld [vmem:[#allocation7 + $0x68] sm:$0xff]  ;;  %v212_v23 = vld [vmem:[#allocation7 + $0x60] sm:$0xff]  ;;  %v211_v24 = vld [vmem:[#allocation7 + $0x58] sm:$0xff] }
  0x47   :  { %250 = vmatprep.subr.mxu1 %v225_v10  ;;  %v210_v25 = vld [vmem:[#allocation7 + $0x50] sm:$0xff]  ;;  %v209_v26 = vld [vmem:[#allocation7 + $0x48] sm:$0xff]  ;;  %v208_v27 = vld [vmem:[#allocation7 + $0x40] sm:$0xff] }
  0x48   :  { %251 = vmatpush1.msra.mxu1 %v224_v11  ;;  %v207_v28 = vld [vmem:[#allocation7 + $0x38] sm:$0xff]  ;;  %v206_v29 = vld [vmem:[#allocation7 + $0x30] sm:$0xff]  ;;  %v205_v30 = vld [vmem:[#allocation7 + $0x28] sm:$0xff] }
  0x49   :  { %252 = vmatprep.subr.mxu1 %v223_v12  ;;  %v204_v31 = vld [vmem:[#allocation7 + $0x20] sm:$0xff]  ;;  %v203_v32 = vld [vmem:[#allocation7 + $0x18] sm:$0xff]  ;;  %v202_v33 = vld [vmem:[#allocation7 + $0x10] sm:$0xff] }
  0x4a   :  { %253 = vmatpush1.msra.mxu1 %v222_v13  ;;  %v201_v34 = vld [vmem:[#allocation7 + $0x8] sm:$0xff]  ;;  %v200_v35 = vld [vmem:[#allocation7] sm:$0xff]  ;;  %v388_v38 = vld [vmem:[#allocation8 + $0x1f8] sm:$0xff] }
  0x4b   :  { %254 = vmatprep.subr.mxu1 %v221_v14  ;;  %v386_v37 = vld [vmem:[#allocation8 + $0x1e8] sm:$0xff]  ;;  %v385_v39 = vld [vmem:[#allocation8 + $0x1e0] sm:$0xff] }
  0x4c   :  { %255 = vmatpush1.msra.mxu1 %v220_v15  ;;  %475 = vmatprep.subr.mxu0 %v386_v37  ;;  %v382_v40 = vld [vmem:[#allocation8 + $0x1c8] sm:$0xff]  ;;  %v381_v41 = vld [vmem:[#allocation8 + $0x1c0] sm:$0xff]  ;;  %v387_v37 = vld [vmem:[#allocation8 + $0x1f0] sm:$0xff] }
  0x4d   :  { %256 = vmatprep.subr.mxu1 %v219_v16  ;;  %476 = vmatpush1.msra.mxu0 %v385_v39  ;;  %v378_v42 = vld [vmem:[#allocation8 + $0x1a8] sm:$0xff]  ;;  %v377_v43 = vld [vmem:[#allocation8 + $0x1a0] sm:$0xff]  ;;  %v383_v39 = vld [vmem:[#allocation8 + $0x1d0] sm:$0xff] }
  0x4e   :  { %257 = vmatpush1.msra.mxu1 %v218_v17  ;;  %477 = vmatprep.subr.mxu0 %v382_v40  ;;  %v374_v44 = vld [vmem:[#allocation8 + $0x188] sm:$0xff]  ;;  %v373_v45 = vld [vmem:[#allocation8 + $0x180] sm:$0xff]  ;;  %v380_v40 = vld [vmem:[#allocation8 + $0x1b8] sm:$0xff] }
  0x4f   :  { %258 = vmatprep.subr.mxu1 %v217_v18  ;;  %478 = vmatpush1.msra.mxu0 %v381_v41  ;;  %v370_v46 = vld [vmem:[#allocation8 + $0x168] sm:$0xff]  ;;  %v369_v47 = vld [vmem:[#allocation8 + $0x160] sm:$0xff] }
  0x50   :  { %259 = vmatpush1.msra.mxu1 %v216_v19  ;;  %479 = vmatprep.subr.mxu0 %v378_v42  ;;  %v366_v48 = vld [vmem:[#allocation8 + $0x148] sm:$0xff]  ;;  %v365_v49 = vld [vmem:[#allocation8 + $0x140] sm:$0xff]  ;;  %v379_v42 = vld [vmem:[#allocation8 + $0x1b0] sm:$0xff] }
  0x51   :  { %260 = vmatprep.subr.mxu1 %v215_v20  ;;  %480 = vmatpush1.msra.mxu0 %v377_v43  ;;  %v362_v50 = vld [vmem:[#allocation8 + $0x128] sm:$0xff]  ;;  %v361_v51 = vld [vmem:[#allocation8 + $0x120] sm:$0xff]  ;;  %v376_v43 = vld [vmem:[#allocation8 + $0x198] sm:$0xff] }
  0x52   :  { %261 = vmatpush1.msra.mxu1 %v214_v21  ;;  %481 = vmatprep.subr.mxu0 %v374_v44  ;;  %v358_v52 = vld [vmem:[#allocation8 + $0x108] sm:$0xff]  ;;  %v357_v53 = vld [vmem:[#allocation8 + $0x100] sm:$0xff]  ;;  %v375_v44 = vld [vmem:[#allocation8 + $0x190] sm:$0xff] }
  0x53   :  { %262 = vmatprep.subr.mxu1 %v213_v22  ;;  %482 = vmatpush1.msra.mxu0 %v373_v45  ;;  %v354_v54 = vld [vmem:[#allocation8 + $0xe8] sm:$0xff]  ;;  %v353_v55 = vld [vmem:[#allocation8 + $0xe0] sm:$0xff]  ;;  %v372_v45 = vld [vmem:[#allocation8 + $0x178] sm:$0xff] }
  0x54   :  { %263 = vmatpush1.msra.mxu1 %v212_v23  ;;  %483 = vmatprep.subr.mxu0 %v370_v46  ;;  %v350_v56 = vld [vmem:[#allocation8 + $0xc8] sm:$0xff]  ;;  %v349_v57 = vld [vmem:[#allocation8 + $0xc0] sm:$0xff]  ;;  %v371_v46 = vld [vmem:[#allocation8 + $0x170] sm:$0xff] }
  0x55   :  { %264 = vmatprep.subr.mxu1 %v211_v24  ;;  %484 = vmatpush1.msra.mxu0 %v369_v47  ;;  %v346_v58 = vld [vmem:[#allocation8 + $0xa8] sm:$0xff]  ;;  %v345_v59 = vld [vmem:[#allocation8 + $0xa0] sm:$0xff]  ;;  %v368_v47 = vld [vmem:[#allocation8 + $0x158] sm:$0xff] }
  0x56   :  { %265 = vmatpush1.msra.mxu1 %v210_v25  ;;  %485 = vmatprep.subr.mxu0 %v366_v48  ;;  %v342_v60 = vld [vmem:[#allocation8 + $0x88] sm:$0xff]  ;;  %v341_v61 = vld [vmem:[#allocation8 + $0x80] sm:$0xff]  ;;  %v367_v48 = vld [vmem:[#allocation8 + $0x150] sm:$0xff] }
  0x57   :  { %266 = vmatprep.subr.mxu1 %v209_v26  ;;  %486 = vmatpush1.msra.mxu0 %v365_v49  ;;  %v338_v62 = vld [vmem:[#allocation8 + $0x68] sm:$0xff]  ;;  %v337_v63 = vld [vmem:[#allocation8 + $0x60] sm:$0xff]  ;;  %v363_v49 = vld [vmem:[#allocation8 + $0x130] sm:$0xff] }
  0x58   :  { %267 = vmatpush1.msra.mxu1 %v208_v27  ;;  %487 = vmatprep.subr.mxu0 %v362_v50  ;;  %v334_v0 = vld [vmem:[#allocation8 + $0x48] sm:$0xff]  ;;  %v333_v1 = vld [vmem:[#allocation8 + $0x40] sm:$0xff]  ;;  %v360_v50 = vld [vmem:[#allocation8 + $0x118] sm:$0xff] }
  0x59   :  { %268 = vmatprep.subr.mxu1 %v207_v28  ;;  %488 = vmatpush1.msra.mxu0 %v361_v51  ;;  %v330_v2 = vld [vmem:[#allocation8 + $0x28] sm:$0xff]  ;;  %v329_v3 = vld [vmem:[#allocation8 + $0x20] sm:$0xff]  ;;  %v359_v51 = vld [vmem:[#allocation8 + $0x110] sm:$0xff] }
  0x5a   :  { %269 = vmatpush1.msra.mxu1 %v206_v29  ;;  %489 = vmatprep.subr.mxu0 %v358_v52  ;;  %v326_v4 = vld [vmem:[#allocation8 + $0x8] sm:$0xff]  ;;  %v325_v5 = vld [vmem:[#allocation8] sm:$0xff]  ;;  %v356_v52 = vld [vmem:[#allocation8 + $0xf8] sm:$0xff] }
  0x5b   :  { %270 = vmatprep.subr.mxu1 %v205_v30  ;;  %490 = vmatpush1.msra.mxu0 %v357_v53  ;;  %v450_v6 = vld [vmem:[#allocation8 + $0x3e8] sm:$0xff]  ;;  %v449_v7 = vld [vmem:[#allocation8 + $0x3e0] sm:$0xff]  ;;  %v355_v53 = vld [vmem:[#allocation8 + $0xf0] sm:$0xff] }
  0x5c   :  { %271 = vmatpush1.msra.mxu1 %v204_v31  ;;  %491 = vmatprep.subr.mxu0 %v354_v54  ;;  %v446_v8 = vld [vmem:[#allocation8 + $0x3c8] sm:$0xff]  ;;  %v445_v9 = vld [vmem:[#allocation8 + $0x3c0] sm:$0xff]  ;;  %v352_v54 = vld [vmem:[#allocation8 + $0xd8] sm:$0xff] }
  0x5d   :  { %272 = vmatprep.subr.mxu1 %v203_v32  ;;  %492 = vmatpush1.msra.mxu0 %v353_v55  ;;  %v442_v10 = vld [vmem:[#allocation8 + $0x3a8] sm:$0xff]  ;;  %v441_v11 = vld [vmem:[#allocation8 + $0x3a0] sm:$0xff]  ;;  %v351_v55 = vld [vmem:[#allocation8 + $0xd0] sm:$0xff] }
  0x5e   :  { %273 = vmatpush1.msra.mxu1 %v202_v33  ;;  %493 = vmatprep.subr.mxu0 %v350_v56  ;;  %v438_v12 = vld [vmem:[#allocation8 + $0x388] sm:$0xff]  ;;  %v437_v13 = vld [vmem:[#allocation8 + $0x380] sm:$0xff]  ;;  %v348_v56 = vld [vmem:[#allocation8 + $0xb8] sm:$0xff] }
  0x5f   :  { %274 = vmatprep.subr.mxu1 %v201_v34  ;;  %494 = vmatpush1.msra.mxu0 %v349_v57  ;;  %v434_v14 = vld [vmem:[#allocation8 + $0x368] sm:$0xff]  ;;  %v433_v15 = vld [vmem:[#allocation8 + $0x360] sm:$0xff]  ;;  %v347_v57 = vld [vmem:[#allocation8 + $0xb0] sm:$0xff] }
  0x60   :  { %275 = vmatpush1.msra.mxu1 %v200_v35  ;;  %495 = vmatprep.subr.mxu0 %v346_v58  ;;  %v430_v16 = vld [vmem:[#allocation8 + $0x348] sm:$0xff]  ;;  %v429_v17 = vld [vmem:[#allocation8 + $0x340] sm:$0xff]  ;;  %v344_v58 = vld [vmem:[#allocation8 + $0x98] sm:$0xff] }
  0x61   :  { %552 = vmatprep.subr.mxu1 %v388_v38  ;;  %496 = vmatpush1.msra.mxu0 %v345_v59  ;;  %v426_v18 = vld [vmem:[#allocation8 + $0x328] sm:$0xff]  ;;  %v425_v19 = vld [vmem:[#allocation8 + $0x320] sm:$0xff]  ;;  %v384_v38 = vld [vmem:[#allocation8 + $0x1d8] sm:$0xff] }
  0x62   :  { %497 = vmatprep.subr.mxu0 %v342_v60  ;;  %v422_v20 = vld [vmem:[#allocation8 + $0x308] sm:$0xff]  ;;  %v421_v21 = vld [vmem:[#allocation8 + $0x300] sm:$0xff]  ;;  %v343_v59 = vld [vmem:[#allocation8 + $0x90] sm:$0xff] }
  0x63   :  { %498 = vmatpush1.msra.mxu0 %v341_v61  ;;  %v418_v22 = vld [vmem:[#allocation8 + $0x2e8] sm:$0xff]  ;;  %v417_v23 = vld [vmem:[#allocation8 + $0x2e0] sm:$0xff]  ;;  %v340_v60 = vld [vmem:[#allocation8 + $0x78] sm:$0xff] }
  0x64   :  { %499 = vmatprep.subr.mxu0 %v338_v62  ;;  %v414_v24 = vld [vmem:[#allocation8 + $0x2c8] sm:$0xff]  ;;  %v413_v25 = vld [vmem:[#allocation8 + $0x2c0] sm:$0xff]  ;;  %v339_v61 = vld [vmem:[#allocation8 + $0x70] sm:$0xff] }
  0x65   :  { %500 = vmatpush1.msra.mxu0 %v337_v63  ;;  %v410_v26 = vld [vmem:[#allocation8 + $0x2a8] sm:$0xff]  ;;  %v409_v27 = vld [vmem:[#allocation8 + $0x2a0] sm:$0xff]  ;;  %v336_v62 = vld [vmem:[#allocation8 + $0x58] sm:$0xff] }
  0x66   :  { %501 = vmatprep.subr.mxu0 %v334_v0  ;;  %v406_v28 = vld [vmem:[#allocation8 + $0x288] sm:$0xff]  ;;  %v405_v29 = vld [vmem:[#allocation8 + $0x280] sm:$0xff]  ;;  %v335_v63 = vld [vmem:[#allocation8 + $0x50] sm:$0xff] }
  0x67   :  { %502 = vmatpush1.msra.mxu0 %v333_v1  ;;  %v891_v31 = vld [vmem:[%s1259_s2] ss:$0 sm:$0xff]  ;;  %v332_v0 = vld [vmem:[#allocation8 + $0x38] sm:$0xff]  ;;  %v331_v1 = vld [vmem:[#allocation8 + $0x30] sm:$0xff] }
  0x68   :  { %503 = vmatprep.subr.mxu0 %v330_v2  ;;  %v328_v2 = vld [vmem:[#allocation8 + $0x18] sm:$0xff] }
  0x69   :  { %504 = vmatpush1.msra.mxu0 %v329_v3  ;;  %v327_v3 = vld [vmem:[#allocation8 + $0x10] sm:$0xff] }
  0x6a   :  { %505 = vmatprep.subr.mxu0 %v326_v4  ;;  %v452_v4 = vld [vmem:[#allocation8 + $0x3f8] sm:$0xff] }
  0x6b   :  { %506 = vmatpush1.msra.mxu0 %v325_v5  ;;  %v451_v5 = vld [vmem:[#allocation8 + $0x3f0] sm:$0xff] }
  0x6c   :  { %507 = vmatprep.subr.mxu0 %v450_v6  ;;  %v448_v6 = vld [vmem:[#allocation8 + $0x3d8] sm:$0xff] }
  0x6d   :  { %508 = vmatpush2.msra.mxu0 %v449_v7  ;;  %v447_v7 = vld [vmem:[#allocation8 + $0x3d0] sm:$0xff] }
  0x6e   :  { %509 = vmatprep.subr.mxu0 %v446_v8  ;;  %v444_v8 = vld [vmem:[#allocation8 + $0x3b8] sm:$0xff] }
  0x6f   :  { %510 = vmatpush2.msra.mxu0 %v445_v9  ;;  %v443_v9 = vld [vmem:[#allocation8 + $0x3b0] sm:$0xff] }
  0x70   :  { %511 = vmatprep.subr.mxu0 %v442_v10  ;;  %v440_v10 = vld [vmem:[#allocation8 + $0x398] sm:$0xff] }
  0x71   :  { %512 = vmatpush2.msra.mxu0 %v441_v11  ;;  %v439_v11 = vld [vmem:[#allocation8 + $0x390] sm:$0xff] }
  0x72   :  { %513 = vmatprep.subr.mxu0 %v438_v12  ;;  %v436_v12 = vld [vmem:[#allocation8 + $0x378] sm:$0xff] }
  0x73   :  { %514 = vmatpush2.msra.mxu0 %v437_v13  ;;  %v435_v13 = vld [vmem:[#allocation8 + $0x370] sm:$0xff] }
  0x74   :  { %515 = vmatprep.subr.mxu0 %v434_v14  ;;  %v432_v14 = vld [vmem:[#allocation8 + $0x358] sm:$0xff] }
  0x75   :  { %516 = vmatpush2.msra.mxu0 %v433_v15  ;;  %v431_v15 = vld [vmem:[#allocation8 + $0x350] sm:$0xff] }
  0x76   :  { %517 = vmatprep.subr.mxu0 %v430_v16  ;;  %v428_v16 = vld [vmem:[#allocation8 + $0x338] sm:$0xff] }
  0x77   :  { %518 = vmatpush2.msra.mxu0 %v429_v17  ;;  %v427_v17 = vld [vmem:[#allocation8 + $0x330] sm:$0xff] }
  0x78   :  { %519 = vmatprep.subr.mxu0 %v426_v18  ;;  %v424_v18 = vld [vmem:[#allocation8 + $0x318] sm:$0xff] }
  0x79   :  { %520 = vmatpush2.msra.mxu0 %v425_v19  ;;  %v423_v19 = vld [vmem:[#allocation8 + $0x310] sm:$0xff] }
  0x7a   :  { %521 = vmatprep.subr.mxu0 %v422_v20  ;;  %v420_v20 = vld [vmem:[#allocation8 + $0x2f8] sm:$0xff] }
  0x7b   :  { %522 = vmatpush2.msra.mxu0 %v421_v21  ;;  %v419_v21 = vld [vmem:[#allocation8 + $0x2f0] sm:$0xff] }
  0x7c   :  { %523 = vmatprep.subr.mxu0 %v418_v22  ;;  %v416_v22 = vld [vmem:[#allocation8 + $0x2d8] sm:$0xff] }
  0x7d   :  { %524 = vmatpush2.msra.mxu0 %v417_v23  ;;  %v415_v23 = vld [vmem:[#allocation8 + $0x2d0] sm:$0xff] }
  0x7e   :  { %525 = vmatprep.subr.mxu0 %v414_v24  ;;  %v412_v24 = vld [vmem:[#allocation8 + $0x2b8] sm:$0xff] }
  0x7f   :  { %526 = vmatpush2.msra.mxu0 %v413_v25  ;;  %v411_v25 = vld [vmem:[#allocation8 + $0x2b0] sm:$0xff] }
  0x80   :  { %527 = vmatprep.subr.mxu0 %v410_v26  ;;  %v408_v26 = vld [vmem:[#allocation8 + $0x298] sm:$0xff] }
  0x81   :  { %528 = vmatpush2.msra.mxu0 %v409_v27  ;;  %v407_v27 = vld [vmem:[#allocation8 + $0x290] sm:$0xff] }
  0x82   :  { %529 = vmatprep.subr.mxu0 %v406_v28  ;;  %v402_v28 = vld [vmem:[#allocation8 + $0x268] sm:$0xff] }
  0x83   :  { %530 = vmatpush2.msra.mxu0 %v405_v29  ;;  %v404_v29 = vld [vmem:[#allocation8 + $0x278] sm:$0xff] }
  0x84   :  { %531 = vmatprep.subr.mxu0 %v402_v28  ;;  %v693_v28 = vld [vmem:[#allocation10 + $0x1c0] sm:$0xff] }
 0x103   :  { %v984_v30 = vpop.f32.mrf.mxu0 }
 0x104   :  { %v195_v34 = vadd.f32 %v984_v30, %v891_v31  ;;  %v401_v30 = vld [vmem:[#allocation8 + $0x260] sm:$0xff] }
 0x105   :  { %v189_v32 = vpop.f32.mrf.mxu0  ;;  %532 = vmatpush2.msra.mxu0 %v401_v30  ;;  %v677_v30 = vld [vmem:[#allocation10 + $0x140] sm:$0xff] }
 0x106   :  { %v190_v33 = vadd.f32 %v891_v31, %v189_v32  ;;  %v199_v41 = vmax.f32 %v195_v34, 0.0  ;;  %v403_v31 = vld [vmem:[#allocation8 + $0x270] sm:$0xff]  ;;  %v398_v32 = vld [vmem:[#allocation8 + $0x248] sm:$0xff]  ;;  %v397_v34 = vld [vmem:[#allocation8 + $0x240] sm:$0xff] }
 0x107   :  { %533 = vmatprep.subr.mxu0 %v398_v32  ;;  %v692_v32 = vld [vmem:[#allocation10 + $0x1b8] sm:$0xff] }
 0x108   :  { %v198_v35 = vmax.f32 %v190_v33, 0.0  ;;  %v400_v33 = vld [vmem:[#allocation8 + $0x258] sm:$0xff]  ;;  %534 = vmatpush2.msra.mxu0 %v397_v34 }
 0x109   :  { %v676_v34 = vld [vmem:[#allocation10 + $0x138] sm:$0xff] }
 0x10a   :  { %309 = vmatmul.mubr.f32.vlgmr.msra.gmra.mxu1 %v198_v35  ;;  %v399_v35 = vld [vmem:[#allocation8 + $0x250] sm:$0xff] }
 0x10b   :  { %314 = vmatprep.mubr.f32.mxu1 %v1145_v36  ;;  %553 = vmatpush1.msra.mxu1 %v387_v37  ;;  %v364_v36 = vld [vmem:[#allocation8 + $0x138] sm:$0xff]  ;;  %v394_v37 = vld [vmem:[#allocation8 + $0x228] sm:$0xff] }
 0x10c   :  { %554 = vmatprep.subr.mxu1 %v384_v38  ;;  %v396_v38 = vld [vmem:[#allocation8 + $0x238] sm:$0xff]  ;;  %535 = vmatprep.subr.mxu0 %v394_v37  ;;  %v691_v37 = vld [vmem:[#allocation10 + $0x1b0] sm:$0xff] }
 0x10d   :  { %555 = vmatpush1.msra.mxu1 %v383_v39  ;;  %v393_v39 = vld [vmem:[#allocation8 + $0x220] sm:$0xff] }
 0x10e   :  { %315 = vmatmul.mubr.f32.gmra.mxu1 %v199_v41  ;;  %556 = vmatprep.subr.mxu1 %v380_v40  ;;  %v395_v40 = vld [vmem:[#allocation8 + $0x230] sm:$0xff]  ;;  %v390_v41 = vld [vmem:[#allocation8 + $0x208] sm:$0xff] }
 0x10f   :  { %557 = vmatpush1.msra.mxu1 %v379_v42  ;;  %536 = vmatpush2.msra.mxu0 %v393_v39  ;;  %v392_v42 = vld [vmem:[#allocation8 + $0x218] sm:$0xff]  ;;  %v675_v39 = vld [vmem:[#allocation10 + $0x130] sm:$0xff] }
 0x110   :  { %558 = vmatprep.subr.mxu1 %v376_v43  ;;  %537 = vmatprep.subr.mxu0 %v390_v41  ;;  %v389_v43 = vld [vmem:[#allocation8 + $0x200] sm:$0xff]  ;;  %v690_v41 = vld [vmem:[#allocation10 + $0x1a8] sm:$0xff] }
 0x111   :  { %559 = vmatpush1.msra.mxu1 %v375_v44  ;;  %v391_v44 = vld [vmem:[#allocation8 + $0x210] sm:$0xff]  ;;  %538 = vmatpush2.msra.mxu0 %v389_v43  ;;  %v674_v43 = vld [vmem:[#allocation10 + $0x128] sm:$0xff] }
 0x112   :  { %560 = vmatprep.subr.mxu1 %v372_v45  ;;  %v668_v45 = vld [vmem:[#allocation10 + $0xf8] sm:$0xff] }
 0x113   :  { %561 = vmatpush1.msra.mxu1 %v371_v46  ;;  %v700_v46 = vld [vmem:[#allocation10 + $0x1f8] sm:$0xff]  ;;  %902 = vmatprep.subr.mxu0 %v668_v45  ;;  %v689_v45 = vld [vmem:[#allocation10 + $0x1a0] sm:$0xff] }
 0x114   :  { %562 = vmatprep.subr.mxu1 %v368_v47  ;;  %v234_v47 = vlaneseq }
 0x115   :  { %563 = vmatpush1.msra.mxu1 %v367_v48 }
 0x116   :  { %564 = vmatprep.subr.mxu1 %v364_v36  ;;  %v1228_v48 = vshrl.u32 %v234_v47, 7  ;;  %v673_v47 = vld [vmem:[#allocation10 + $0x120] sm:$0xff] }
 0x117   :  { %565 = vmatpush1.msra.mxu1 %v363_v49  ;;  %v232_v49 = vld [vmem:[%s1261_s4] sm:$0x3] }
 0x118   :  { %566 = vmatprep.subr.mxu1 %v360_v50  ;;  %v236_v36 = vsub.s32 0, %v1228_v48  ;;  %v240_v50 = vsub.s32 1, %v1228_v48 }
 0x119   :  { %567 = vmatpush1.msra.mxu1 %v359_v51 }
 0x11a   :  { %568 = vmatprep.subr.mxu1 %v356_v52  ;;  %v237_v51 = vrot.slane %v232_v49, %v236_v36  ;;  %v241_v52 = vrot.slane %v232_v49, %v240_v50  ;;  %v656_v49 = vld [vmem:[#allocation10 + $0x98] sm:$0xff] }
 0x11b   :  { %569 = vmatpush1.msra.mxu1 %v355_v53 }
 0x11c   :  { %570 = vmatprep.subr.mxu1 %v352_v54 }
 0x11d   :  { %571 = vmatpush1.msra.mxu1 %v351_v55 }
 0x11e   :  { %572 = vmatprep.subr.mxu1 %v348_v56 }
 0x11f   :  { %573 = vmatpush1.msra.mxu1 %v347_v57 }
 0x120   :  { %574 = vmatprep.subr.mxu1 %v344_v58 }
 0x121   :  { %575 = vmatpush1.msra.mxu1 %v343_v59 }
 0x122   :  { %576 = vmatprep.subr.mxu1 %v340_v60 }
 0x123   :  { %577 = vmatpush1.msra.mxu1 %v339_v61 }
 0x124   :  { %578 = vmatprep.subr.mxu1 %v336_v62  ;;  %v652_v62 = vld [vmem:[#allocation10 + $0x78] sm:$0xff] }
 0x125   :  { %579 = vmatpush1.msra.mxu1 %v335_v63  ;;  %v684_v63 = vld [vmem:[#allocation10 + $0x178] sm:$0xff] }
 0x126   :  { %580 = vmatprep.subr.mxu1 %v332_v0 }
 0x127   :  { %581 = vmatpush1.msra.mxu1 %v331_v1  ;;  %v667_v1 = vld [vmem:[#allocation10 + $0xf0] sm:$0xff] }
 0x128   :  { %582 = vmatprep.subr.mxu1 %v328_v2  ;;  %v699_v2 = vld [vmem:[#allocation10 + $0x1f0] sm:$0xff] }
 0x129   :  { %583 = vmatpush1.msra.mxu1 %v327_v3 }
 0x12a   :  { %584 = vmatprep.subr.mxu1 %v452_v4 }
 0x12b   :  { %585 = vmatpush2.msra.mxu1 %v451_v5  ;;  %v651_v5 = vld [vmem:[#allocation10 + $0x70] sm:$0xff] }
 0x12c   :  { %586 = vmatprep.subr.mxu1 %v448_v6  ;;  %v683_v6 = vld [vmem:[#allocation10 + $0x170] sm:$0xff] }
 0x12d   :  { %587 = vmatpush2.msra.mxu1 %v447_v7  ;;  %v666_v7 = vld [vmem:[#allocation10 + $0xe8] sm:$0xff] }
 0x12e   :  { %588 = vmatprep.subr.mxu1 %v444_v8  ;;  %v698_v8 = vld [vmem:[#allocation10 + $0x1e8] sm:$0xff] }
 0x12f   :  { %589 = vmatpush2.msra.mxu1 %v443_v9  ;;  %v650_v9 = vld [vmem:[#allocation10 + $0x68] sm:$0xff] }
 0x130   :  { %590 = vmatprep.subr.mxu1 %v440_v10  ;;  %v682_v10 = vld [vmem:[#allocation10 + $0x168] sm:$0xff] }
 0x131   :  { %591 = vmatpush2.msra.mxu1 %v439_v11  ;;  %v665_v11 = vld [vmem:[#allocation10 + $0xe0] sm:$0xff] }
 0x132   :  { %592 = vmatprep.subr.mxu1 %v436_v12  ;;  %v697_v12 = vld [vmem:[#allocation10 + $0x1e0] sm:$0xff] }
 0x133   :  { %593 = vmatpush2.msra.mxu1 %v435_v13  ;;  %v649_v13 = vld [vmem:[#allocation10 + $0x60] sm:$0xff] }
 0x134   :  { %594 = vmatprep.subr.mxu1 %v432_v14  ;;  %v681_v14 = vld [vmem:[#allocation10 + $0x160] sm:$0xff] }
 0x135   :  { %595 = vmatpush2.msra.mxu1 %v431_v15  ;;  %v664_v15 = vld [vmem:[#allocation10 + $0xd8] sm:$0xff] }
 0x136   :  { %596 = vmatprep.subr.mxu1 %v428_v16  ;;  %v696_v16 = vld [vmem:[#allocation10 + $0x1d8] sm:$0xff] }
 0x137   :  { %597 = vmatpush2.msra.mxu1 %v427_v17  ;;  %v648_v17 = vld [vmem:[#allocation10 + $0x58] sm:$0xff] }
 0x138   :  { %598 = vmatprep.subr.mxu1 %v424_v18  ;;  %v680_v18 = vld [vmem:[#allocation10 + $0x158] sm:$0xff] }
 0x139   :  { %599 = vmatpush2.msra.mxu1 %v423_v19  ;;  %v663_v19 = vld [vmem:[#allocation10 + $0xd0] sm:$0xff] }
 0x13a   :  { %600 = vmatprep.subr.mxu1 %v420_v20  ;;  %v695_v20 = vld [vmem:[#allocation10 + $0x1d0] sm:$0xff] }
 0x13b   :  { %601 = vmatpush2.msra.mxu1 %v419_v21  ;;  %v647_v21 = vld [vmem:[#allocation10 + $0x50] sm:$0xff] }
 0x13c   :  { %602 = vmatprep.subr.mxu1 %v416_v22  ;;  %v679_v22 = vld [vmem:[#allocation10 + $0x150] sm:$0xff] }
 0x13d   :  { %603 = vmatpush2.msra.mxu1 %v415_v23  ;;  %v662_v23 = vld [vmem:[#allocation10 + $0xc8] sm:$0xff] }
 0x13e   :  { %604 = vmatprep.subr.mxu1 %v412_v24  ;;  %v694_v24 = vld [vmem:[#allocation10 + $0x1c8] sm:$0xff] }
 0x13f   :  { %605 = vmatpush2.msra.mxu1 %v411_v25  ;;  %v646_v25 = vld [vmem:[#allocation10 + $0x48] sm:$0xff] }
 0x140   :  { %606 = vmatprep.subr.mxu1 %v408_v26  ;;  %v678_v26 = vld [vmem:[#allocation10 + $0x148] sm:$0xff] }
 0x141   :  { %607 = vmatpush2.msra.mxu1 %v407_v27  ;;  %v661_v27 = vld [vmem:[#allocation10 + $0xc0] sm:$0xff] }
 0x142   :  { %608 = vmatprep.subr.mxu1 %v404_v29  ;;  %v645_v29 = vld [vmem:[#allocation10 + $0x40] sm:$0xff] }
 0x143   :  { %609 = vmatpush2.msra.mxu1 %v403_v31  ;;  %v660_v31 = vld [vmem:[#allocation10 + $0xb8] sm:$0xff] }
 0x144   :  { %610 = vmatprep.subr.mxu1 %v400_v33  ;;  %v644_v33 = vld [vmem:[#allocation10 + $0x38] sm:$0xff] }
 0x145   :  { %611 = vmatpush2.msra.mxu1 %v399_v35  ;;  %v659_v35 = vld [vmem:[#allocation10 + $0xb0] sm:$0xff] }
 0x146   :  { %612 = vmatprep.subr.mxu1 %v396_v38  ;;  %v643_v38 = vld [vmem:[#allocation10 + $0x30] sm:$0xff] }
 0x147   :  { %613 = vmatpush2.msra.mxu1 %v395_v40  ;;  %v658_v40 = vld [vmem:[#allocation10 + $0xa8] sm:$0xff] }
 0x148   :  { %614 = vmatprep.subr.mxu1 %v392_v42  ;;  %v642_v42 = vld [vmem:[#allocation10 + $0x28] sm:$0xff] }
 0x149   :  { %615 = vmatpush2.msra.mxu1 %v391_v44  ;;  %v657_v44 = vld [vmem:[#allocation10 + $0xa0] sm:$0xff] }
 0x14a   :  { %940 = vmatprep.subr.mxu1 %v700_v46  ;;  %v641_v46 = vld [vmem:[#allocation10 + $0x20] sm:$0xff] }
 0x1ca   :  { %v310_v53 = vpop.f32.mrf.mxu1 }
 0x1cb   :  { %v311_v54 = vadd.f32 %v310_v53, %v237_v51  ;;  %v672_v53 = vld [vmem:[#allocation10 + $0x118] sm:$0xff] }
 0x1cc   :  { %v312_v55 = vpop.f32.mrf.mxu1 }
 0x1cd   :  { %v313_v56 = vadd.f32 %v312_v55, %v241_v52  ;;  %v321_v59 = vmax.f32 %v311_v54, 0.0  ;;  %v655_v54 = vld [vmem:[#allocation10 + $0x90] sm:$0xff] }
 0x1ce   :  { %v316_v57 = vpop.f32.mrf.mxu1  ;;  %v687_v55 = vld [vmem:[#allocation10 + $0x190] sm:$0xff] }
 0x1cf   :  { %v322_v58 = vmax.f32 %v313_v56, 0.0  ;;  %v317_v60 = vadd.f32 %v316_v57, %v237_v51  ;;  %v688_v51 = vld [vmem:[#allocation10 + $0x198] sm:$0xff]  ;;  %v639_v56 = vld [vmem:[#allocation10 + $0x10] sm:$0xff] }
 0x1d0   :  { %v318_v61 = vpop.f32.mrf.mxu1  ;;  %v671_v57 = vld [vmem:[#allocation10 + $0x110] sm:$0xff] }
 0x1d1   :  { %v319_v0 = vadd.f32 %v318_v61, %v241_v52  ;;  %539 = vmatprep.mubr.f32.mxu0 %v322_v58  ;;  %616 = vmatprep.mubr.f32.mxu1 %v322_v58  ;;  %v323_v4 = vmax.f32 %v317_v60, 0.0  ;;  %v640_v52 = vld [vmem:[#allocation10 + $0x18] sm:$0xff]  ;;  %v654_v58 = vld [vmem:[#allocation10 + $0x88] sm:$0xff] }
 0x1d2   :  { %540 = vmatmul.mubr.f32.vlgmr.msra.gmra.mxu0 %v321_v59  ;;  %617 = vmatmul.mubr.f32.vlgmr.msra.gmra.mxu1 %v321_v59  ;;  %v686_v59 = vld [vmem:[#allocation10 + $0x188] sm:$0xff] }
 0x1d3   :  { %v324_v3 = vmax.f32 %v319_v0, 0.0  ;;  %903 = vmatpush3.msra.mxu0 %v652_v62  ;;  %941 = vmatpush3.msra.mxu1 %v684_v63  ;;  %v638_v60 = vld [vmem:[#allocation10 + $0x8] sm:$0xff]  ;;  %v653_v62 = vld [vmem:[#allocation10 + $0x80] sm:$0xff] }
 0x1d4   :  { %904 = vmatprep.subr.mxu0 %v667_v1  ;;  %942 = vmatprep.subr.mxu1 %v699_v2  ;;  %v670_v61 = vld [vmem:[#allocation10 + $0x108] sm:$0xff]  ;;  %v685_v63 = vld [vmem:[#allocation10 + $0x180] sm:$0xff]  ;;  %v465_v2 = vsub.s32 2, %v1228_v48 }
 0x1d5   :  { %545 = vmatprep.mubr.f32.mxu0 %v324_v3  ;;  %622 = vmatprep.mubr.f32.mxu1 %v324_v3  ;;  %v637_v0 = vld [vmem:[#allocation10] sm:$0xff] }
 0x1d6   :  { %546 = vmatmul.mubr.f32.gmra.mxu0 %v323_v4  ;;  %623 = vmatmul.mubr.f32.gmra.mxu1 %v323_v4  ;;  %v669_v1 = vld [vmem:[#allocation10 + $0x100] sm:$0xff]  ;;  %v469_v4 = vsub.s32 3, %v1228_v48 }
 0x1d7   :  { %905 = vmatpush3.msra.mxu0 %v651_v5  ;;  %943 = vmatpush3.msra.mxu1 %v683_v6  ;;  %v453_v3 = vld [vmem:[%s1263_s6] sm:$0xf] }
 0x1d8   :  { %906 = vmatprep.subr.mxu0 %v666_v7  ;;  %944 = vmatprep.subr.mxu1 %v698_v8  ;;  %v458_v5 = vrot.slane %v453_v3, %v236_v36  ;;  %v466_v6 = vrot.slane %v453_v3, %v465_v2  ;;  %v462_v7 = vrot.slane %v453_v3, %v240_v50 }
 0x1d9   :  { %907 = vmatpush3.msra.mxu0 %v650_v9  ;;  %945 = vmatpush3.msra.mxu1 %v682_v10  ;;  %v470_v8 = vrot.slane %v453_v3, %v469_v4 }
 0x1da   :  { %908 = vmatprep.subr.mxu0 %v665_v11  ;;  %946 = vmatprep.subr.mxu1 %v697_v12 }
 0x1db   :  { %909 = vmatpush3.msra.mxu0 %v649_v13  ;;  %947 = vmatpush3.msra.mxu1 %v681_v14 }
 0x1dc   :  { %910 = vmatprep.subr.mxu0 %v664_v15  ;;  %948 = vmatprep.subr.mxu1 %v696_v16 }
 0x1dd   :  { %911 = vmatpush3.msra.mxu0 %v648_v17  ;;  %949 = vmatpush3.msra.mxu1 %v680_v18 }
 0x1de   :  { %912 = vmatprep.subr.mxu0 %v663_v19  ;;  %950 = vmatprep.subr.mxu1 %v695_v20 }
 0x1df   :  { %913 = vmatpush3.msra.mxu0 %v647_v21  ;;  %951 = vmatpush3.msra.mxu1 %v679_v22 }
 0x1e0   :  { %914 = vmatprep.subr.mxu0 %v662_v23  ;;  %952 = vmatprep.subr.mxu1 %v694_v24 }
 0x1e1   :  { %915 = vmatpush3.msra.mxu0 %v646_v25  ;;  %953 = vmatpush3.msra.mxu1 %v678_v26 }
 0x1e2   :  { %916 = vmatprep.subr.mxu0 %v661_v27  ;;  %954 = vmatprep.subr.mxu1 %v693_v28 }
 0x1e3   :  { %917 = vmatpush3.msra.mxu0 %v645_v29  ;;  %955 = vmatpush3.msra.mxu1 %v677_v30 }
 0x1e4   :  { %918 = vmatprep.subr.mxu0 %v660_v31  ;;  %956 = vmatprep.subr.mxu1 %v692_v32  ;;  %v895_v32 = vld [vmem:[%s1265_s8] ss:$0 sm:$0xff]  ;;  %s1146_s8 = smov [#allocation11]  }
 0x1e5   :  { %919 = vmatpush3.msra.mxu0 %v644_v33  ;;  %957 = vmatpush3.msra.mxu1 %v676_v34  ;;  %s877_s21 = sshll.u32 %s1146_s8, 4  ;;  %s878_s21 = int_to_ptr.vmem [resolvable:$true] %s877_s21 }
 0x1e6   :  { %920 = vmatprep.subr.mxu0 %v659_v35  ;;  %958 = vmatprep.subr.mxu1 %v691_v37  ;;  %s1106_s22 = scalar_lea.vmem %s878_s21, 256  ;;  %p1111_p12 = scmp.lt.s32.totalorder %s878_s21, %s878_s21 }
 0x1e7   :  { %921 = vmatpush3.msra.mxu0 %v643_v38  ;;  %959 = vmatpush3.msra.mxu1 %v675_v39  ;;  %p1107_p11 = scmp.ne.s32.totalorder %s878_s21, %s1106_s22  ;;  %p1112_p13 = scmp.lt.s32.totalorder %s1106_s22, %s1106_s22 }
 0x1e8   :  { %922 = vmatprep.subr.mxu0 %v658_v40  ;;  %960 = vmatprep.subr.mxu1 %v690_v41 }
 0x1e9   :  { %923 = vmatpush3.msra.mxu0 %v642_v42  ;;  %961 = vmatpush3.msra.mxu1 %v674_v43  ;;  %p1113_p0 = por %p1112_p13, %p1111_p12 }
 0x1ea   :  { %924 = vmatprep.subr.mxu0 %v657_v44  ;;  %962 = vmatprep.subr.mxu1 %v689_v45 }
 0x1eb   :  { %925 = vmatpush3.msra.mxu0 %v641_v46  ;;  %963 = vmatpush3.msra.mxu1 %v673_v47  ;;  %p1114_p1 = pnand %p1113_p0, %p1107_p11 }
 0x1ec   :  { %926 = vmatprep.subr.mxu0 %v656_v49  ;;  %964 = vmatprep.subr.mxu1 %v688_v51 }
 0x1ed   :  { %927 = vmatpush3.msra.mxu0 %v640_v52  ;;  %965 = vmatpush3.msra.mxu1 %v672_v53 }
 0x1ee   :  { %928 = vmatprep.subr.mxu0 %v655_v54  ;;  %966 = vmatprep.subr.mxu1 %v687_v55 }
 0x1ef   :  { %929 = vmatpush3.msra.mxu0 %v639_v56  ;;  %967 = vmatpush3.msra.mxu1 %v671_v57 }
 0x1f0   :  { %930 = vmatprep.subr.mxu0 %v654_v58  ;;  %968 = vmatprep.subr.mxu1 %v686_v59 }
 0x1f1   :  { %931 = vmatpush3.msra.mxu0 %v638_v60  ;;  %969 = vmatpush3.msra.mxu1 %v670_v61 }
 0x1f2   :  { %932 = vmatprep.subr.mxu0 %v653_v62  ;;  %970 = vmatprep.subr.mxu1 %v685_v63 }
 0x1f3   :  { %933 = vmatpush3.msra.mxu0 %v637_v0  ;;  %971 = vmatpush3.msra.mxu1 %v669_v1 }
 0x292   :  { %v541_v9 = vpop.f32.mrf.mxu0  ;;  %v618_v10 = vpop.f32.mrf.mxu1 }
 0x293   :  { %v542_v11 = vadd.f32 %v541_v9, %v458_v5  ;;  %v619_v12 = vadd.f32 %v618_v10, %v466_v6 }
 0x294   :  { %v543_v13 = vpop.f32.mrf.mxu0  ;;  %v620_v14 = vpop.f32.mrf.mxu1 }
 0x295   :  { %v544_v15 = vadd.f32 %v543_v13, %v462_v7  ;;  %v621_v16 = vadd.f32 %v620_v14, %v470_v8  ;;  %v629_v21 = vmax.f32 %v542_v11, 0.0  ;;  %v631_v22 = vmax.f32 %v619_v12, 0.0 }
 0x296   :  { %v547_v17 = vpop.f32.mrf.mxu0  ;;  %v624_v18 = vpop.f32.mrf.mxu1 }
 0x297   :  { %v630_v19 = vmax.f32 %v544_v15, 0.0  ;;  %v632_v20 = vmax.f32 %v621_v16, 0.0  ;;  %v548_v36 = vadd.f32 %v547_v17, %v458_v5  ;;  %v625_v23 = vadd.f32 %v624_v18, %v466_v6 }
 0x298   :  { %v549_v24 = vpop.f32.mrf.mxu0  ;;  %v626_v48 = vpop.f32.mrf.mxu1 }
 0x299   :  { %v550_v50 = vadd.f32 %v549_v24, %v462_v7  ;;  %v627_v25 = vadd.f32 %v626_v48, %v470_v8  ;;  %772 = vmatprep.mubr.f32.mxu0 %v630_v19  ;;  %847 = vmatprep.mubr.f32.mxu1 %v632_v20  ;;  %v633_v28 = vmax.f32 %v548_v36, 0.0  ;;  %v635_v29 = vmax.f32 %v625_v23, 0.0 }
 0x29a   :  { %773 = vmatmul.mubr.f32.vlgmr.msra.gmra.mxu0 %v629_v21  ;;  %848 = vmatmul.mubr.f32.vlgmr.msra.gmra.mxu1 %v631_v22 }
 0x29b   :  { %v634_v26 = vmax.f32 %v550_v50, 0.0  ;;  %v636_v27 = vmax.f32 %v627_v25, 0.0 }
 0x29d   :  { %777 = vmatprep.mubr.f32.mxu0 %v634_v26  ;;  %852 = vmatprep.mubr.f32.mxu1 %v636_v27 }
 0x29e   :  { %778 = vmatmul.mubr.f32.gmra.mxu0 %v633_v28  ;;  %853 = vmatmul.mubr.f32.gmra.mxu1 %v635_v29 }
 0x35a   :  { %v934_v30 = vpop.f32.mrf.mxu0  ;;  %v972_v31 = vpop.f32.mrf.mxu1 }
 0x35c   :  { %v935_v33 = vpop.f32.mrf.mxu0  ;;  %v973_v34 = vpop.f32.mrf.mxu1 }
 0x35d   :  { %v936_v35 = vadd.f32 %v935_v33, %v934_v30  ;;  %v974_v40 = vadd.f32 %v973_v34, %v972_v31 }
 0x35e   :  { %v937_v37 = vpop.f32.mrf.mxu0  ;;  %v975_v38 = vpop.f32.mrf.mxu1 }
 0x35f   :  { %v775_v39 = vadd.f32 %v936_v35, %v895_v32 }
 0x360   :  { %v938_v41 = vpop.f32.mrf.mxu0  ;;  %v976_v42 = vpop.f32.mrf.mxu1 }
 0x361   :  { %v850_v43 = vadd.f32 %v974_v40, %v775_v39  ;;  %v939_v44 = vadd.f32 %v938_v41, %v937_v37  ;;  %v977_v47 = vadd.f32 %v976_v42, %v975_v38 }
 0x363   :  { %v896_v45 = vmul.f32 -1.442695, %v850_v43  ;;  %v780_v46 = vadd.f32 %v939_v44, %v895_v32 }
 0x365   :  { %998 = vpow2.f32 %v896_v45  ;;  %v855_v49 = vadd.f32 %v977_v47, %v780_v46 }
 0x367   :  { %v897_v51 = vmul.f32 -1.442695, %v855_v49 }
 0x369   :  { %1000 = vpow2.f32 %v897_v51 }
 0x372   :  { %v999_v52 = vpop.eup %998 }
 0x373   :  { %v864_v53 = vadd.f32 1.0, %v999_v52 }
 0x375   :  { %1002 = vrcp.f32 %v864_v53 }
 0x376   :  { %v1001_v54 = vpop.eup %1000 }
 0x377   :  { %v865_v55 = vadd.f32 1.0, %v1001_v54 }
 0x379   :  { %1004 = vrcp.f32 %v865_v55 }
 0x382   :  { %v1003_v56 = vpop.eup %1002 }
 0x383   :  { %870 = vst [vmem:[#allocation11] sm:$0xff] %v1003_v56 }
 0x386   :  { %v1005_v57 = vpop.eup %1004 }
 0x387   :  { %871 = vst [vmem:[#allocation11 + $0x8] sm:$0xff] %v1005_v57 }
 0x388   :  { %1117 = shalt.err (!%p1114_p1)
}
 0x389   :  { %883 = dma.vmem_to_hbm [thread:$0]  %s878_s21, 256, %s1266_s9, [#allocation4], %s1136_s14, %s1136_s14, %s1137_s15  }
 0x38a   :  { %1132 = dma.done.wait [#allocation4], 256  }
 0x38b   :  { %1133 = vsyncadd [#allocation4], 4294967040 }
 0x38c   :  { %887 = vsyncpa [#allocation3], 1 }
 0x38d   :  { %888 = vsyncpa [#allocation6], 1 }
 0x38e   :  { %889 = vsyncpa [#allocation9], 1 }
 0x38f   :  { %890 = vsyncpa [#allocation4], 1 }

</bundles_post_ra>
